<compile_context>
chip_gen: v6e
topology: v6e:2x2x1
jax: 0.10.0
libtpu: 0.0.40
codegen_flags: <defaults>
</compile_context>

<pallas_src>
import functools

import jax
import jax.numpy as jnp
from jax.experimental import pallas as pl
from jax.experimental.pallas import tpu as pltpu


def _augment_kernel(bright_ref, contrast_ref, gamma_ref, gmean_ref,
                    mask_ref, img_ref, out_ref, *, V):
    """grid = (B, H // TH); one (1, V, C, TH, W) block per grid step."""
    b = pl.program_id(0)

    bf = bright_ref[b]              # brightness factor (shared across views of b)
    cf = contrast_ref[b]            # contrast factor

    img = img_ref[0]                # (V, C, TH, W) float32

    # --- ColorJitter: brightness ---
    x1 = jnp.clip(img * bf, 0.0, 1.0)

    m = mask_ref[...]               # (TH, W) rectangular zero-mask (view 0 only)

    # --- ColorJitter: contrast (blend toward precomputed per-image gray mean)
    #     + RandomGamma per image with clip_image=True ---
    views = []
    for v in range(V):              # V is small and static
        gm = gmean_ref[b * V + v]   # per-image gray mean (scalar, SMEM)
        g = gamma_ref[b * V + v]    # per-image gamma     (scalar, SMEM)
        xv = jnp.clip((1.0 - cf) * gm + cf * x1[v], 0.0, 1.0)       # (C, TH, W)
        # pow(x, g) = exp(g * log(x)); guard exact zeros so no NaN/Inf leaks.
        yv = jnp.exp(g * jnp.log(jnp.maximum(xv, 1e-30)))
        yv = jnp.where(xv > 0.0, jnp.minimum(yv, 1.0), 0.0)
        if v == 0:
            yv = yv * m             # random_image_mask on the reference view
        views.append(yv)

    out_ref[0] = jnp.stack(views, axis=0)      # single full-block store


def _pick_tile_rows(V, C, H, W, target_bytes=2 << 20):
    """Largest row-tile TH (multiple of 8, dividing H) whose block fits target."""
    if H % 8 != 0:
        return H                    # tiny / odd heights: take the whole image
    lane_w = ((W + 127) // 128) * 128
    bytes_per_row = V * C * lane_w * 4
    best = None
    for cand in range(8, H + 1, 8):
        if H % cand == 0 and cand * bytes_per_row <= target_bytes:
            best = cand
    if best is not None:
        return best
    for cand in range(8, H + 1, 8): # fall back to smallest legal divisor
        if H % cand == 0:
            return cand
    return H


def augmentor_forward(imgs, key):
    """imgs: float32 [B, V, C, H, W] in [0, 1]. Returns (aug_imgs, filter_mask)."""
    B, V, C, H, W = imgs.shape
    assert C == 3, "grayscale weights assume RGB images"

    k1, k2, k3, k4, k5 = jax.random.split(key, 5)
    bright = jax.random.uniform(k1, (B,), jnp.float32, 0.5, 1.5)
    contrast = jax.random.uniform(k2, (B,), jnp.float32, 0.5, 1.5)
    gamma = jax.random.uniform(k3, (B * V,), jnp.float32, 0.7, 2.0)
    fh, fw = H // 4, W // 4
    my = jax.random.randint(k4, (), 0, H - fh, jnp.int32)
    mx = jax.random.randint(k5, (), 0, W - fw, jnp.int32)

    # Per-image grayscale mean of the brightness-adjusted image (contrast ref),
    # precomputed here so row tiles in the kernel stay independent.
    bright_b = bright[:, None, None, None, None]
    x1 = jnp.clip(imgs * bright_b, 0.0, 1.0)
    gray = 0.2989 * x1[:, :, 0] + 0.587 * x1[:, :, 1] + 0.114 * x1[:, :, 2]
    gmean = jnp.mean(gray, axis=(-2, -1)).reshape(B * V).astype(jnp.float32)

    # Rectangular zero-mask, built once (identical for every batch element).
    rows = jnp.arange(H, dtype=jnp.int32)[:, None]
    cols = jnp.arange(W, dtype=jnp.int32)[None, :]
    inside = (rows >= my) & (rows < my + fh) & (cols >= mx) & (cols < mx + fw)
    mask2d = jnp.where(inside, 0.0, 1.0).astype(jnp.float32)          # (H, W)

    TH = _pick_tile_rows(V, C, H, W)
    NT = H // TH

    # VMEM budget from the actual tiled-block footprint (TH pads to 8 sublanes,
    # W to 128 lanes); capped at 48 MiB so it is safe on v7x as well.
    pad_th = ((TH + 7) // 8) * 8
    pad_w = ((W + 127) // 128) * 128
    img_block_bytes = V * C * pad_th * pad_w * 4
    mask_block_bytes = pad_th * pad_w * 4
    needed = 10 * img_block_bytes + 2 * mask_block_bytes + (2 << 20)
    vmem_limit = int(min(max(32 << 20, needed), 48 << 20))

    out = pl.pallas_call(
        functools.partial(_augment_kernel, V=V),
        out_shape=jax.ShapeDtypeStruct((B, V, C, H, W), jnp.float32),
        grid_spec=pl.GridSpec(
            grid=(B, NT),
            in_specs=[
                pl.BlockSpec(memory_space=pltpu.MemorySpace.SMEM),   # bright (B,)
                pl.BlockSpec(memory_space=pltpu.MemorySpace.SMEM),   # contrast (B,)
                pl.BlockSpec(memory_space=pltpu.MemorySpace.SMEM),   # gamma (B*V,)
                pl.BlockSpec(memory_space=pltpu.MemorySpace.SMEM),   # gray mean (B*V,)
                pl.BlockSpec((TH, W), lambda b, t: (t, 0)),          # mask tile
                pl.BlockSpec((1, V, C, TH, W), lambda b, t: (b, 0, 0, t, 0)),
            ],
            out_specs=pl.BlockSpec((1, V, C, TH, W),
                                   lambda b, t: (b, 0, 0, t, 0)),
        ),
        compiler_params=pltpu.CompilerParams(
            dimension_semantics=("parallel", "parallel"),
            vmem_limit_bytes=vmem_limit),
    )(bright, contrast, gamma, gmean, mask2d, imgs)

    # Match the PyTorch module's [B, C, H, W] filter_mask shape.
    filter_mask = jnp.broadcast_to(mask2d[None, None], (B, C, H, W))
    return out, filter_mask


if __name__ == "__main__":
    key = jax.random.PRNGKey(0)
    k_img, k_aug = jax.random.split(key)
    # Small MVS-like input: batch=2, views=3, RGB, 16x16.
    B, V, C, H, W = 2, 3, 3, 16, 16
    imgs = jax.random.uniform(k_img, (B, V, C, H, W), jnp.float32, 0.0, 1.0)

    out_imgs, filter_mask = augmentor_forward(imgs, k_aug)
    jax.block_until_ready(out_imgs)
    jax.block_until_ready(filter_mask)

    assert out_imgs.shape == (B, V, C, H, W)
    assert filter_mask.shape == (B, C, H, W)
    # Mask must zero out exactly (H//4)*(W//4) pixels per channel.
    zeros_per_chan = (H // 4) * (W // 4)
    assert int(jnp.sum(filter_mask[0, 0] == 0.0)) == zeros_per_chan
    # Reference view's masked rectangle must be zeroed in the output.
    assert float(jnp.max(jnp.abs(out_imgs[:, 0] * (1.0 - filter_mask)))) == 0.0
    # Augmented values stay in [0, 1].
    assert float(jnp.min(out_imgs)) >= 0.0 and float(jnp.max(out_imgs)) <= 1.0

    print("KERNEL_OK")
</pallas_src>

<mosaic_0001>
module attributes {stable_mosaic.version = 11 : i64} {
  func.func @_augment_kernel(%arg0: i32, %arg1: i32, %arg2: memref<2xf32, #tpu.memory_space<smem>>, %arg3: memref<2xf32, #tpu.memory_space<smem>>, %arg4: memref<6xf32, #tpu.memory_space<smem>>, %arg5: memref<6xf32, #tpu.memory_space<smem>>, %arg6: memref<16x16xf32, #tpu.memory_space<vmem>>, %arg7: memref<1x3x3x16x16xf32, #tpu.memory_space<vmem>>, %arg8: memref<1x3x3x16x16xf32, #tpu.memory_space<vmem>>) attributes {dimension_semantics = [#tpu.dimension_semantics<parallel>, #tpu.dimension_semantics<parallel>], iteration_bounds = array<i64: 2, 1>, scalar_prefetch = 0 : i64, scratch_operands = 0 : i64, tpu.core_type = #tpu.core_type<tc>, window_params = [{transform_indices = @transform_0, window_bounds = array<i64: 2>}, {transform_indices = @transform_1, window_bounds = array<i64: 2>}, {transform_indices = @transform_2, window_bounds = array<i64: 6>}, {transform_indices = @transform_3, window_bounds = array<i64: 6>}, {transform_indices = @transform_4, window_bounds = array<i64: 16, 16>}, {transform_indices = @transform_5, window_bounds = array<i64: 1, 3, 3, 16, 16>}, {transform_indices = @transform_6, window_bounds = array<i64: 1, 3, 3, 16, 16>}]} {
    %0 = arith.index_cast %arg0 : i32 to index
    %1 = memref.load %arg2[%0] : memref<2xf32, #tpu.memory_space<smem>>
    %2 = arith.index_cast %arg0 : i32 to index
    %3 = memref.load %arg3[%2] : memref<2xf32, #tpu.memory_space<smem>>
    %c0 = arith.constant 0 : index
    %c0_0 = arith.constant 0 : index
    %c0_1 = arith.constant 0 : index
    %c0_2 = arith.constant 0 : index
    %c0_3 = arith.constant 0 : index
    %4 = vector.load %arg7[%c0, %c0_0, %c0_1, %c0_2, %c0_3] : memref<1x3x3x16x16xf32, #tpu.memory_space<vmem>>, vector<1x3x3x16x16xf32>
    %5 = vector.shape_cast %4 : vector<1x3x3x16x16xf32> to vector<3x3x16x16xf32>
    %6 = vector.broadcast %1 : f32 to vector<3x3x16x16xf32>
    %7 = arith.mulf %5, %6 : vector<3x3x16x16xf32>
    %cst = arith.constant 0.000000e+00 : f32
    %cst_4 = arith.constant 1.000000e+00 : f32
    %8 = vector.broadcast %cst : f32 to vector<3x3x16x16xf32>
    %9 = arith.maximumf %8, %7 : vector<3x3x16x16xf32>
    %10 = vector.broadcast %cst_4 : f32 to vector<3x3x16x16xf32>
    %11 = arith.minimumf %10, %9 : vector<3x3x16x16xf32>
    %c0_5 = arith.constant 0 : index
    %c0_6 = arith.constant 0 : index
    %12 = vector.load %arg6[%c0_5, %c0_6] : memref<16x16xf32, #tpu.memory_space<vmem>>, vector<16x16xf32>
    %c3_i32 = arith.constant 3 : i32
    %13 = arith.muli %arg0, %c3_i32 : i32
    %c0_i32 = arith.constant 0 : i32
    %14 = arith.addi %13, %c0_i32 : i32
    %15 = arith.index_cast %14 : i32 to index
    %16 = memref.load %arg5[%15] : memref<6xf32, #tpu.memory_space<smem>>
    %c3_i32_7 = arith.constant 3 : i32
    %17 = arith.muli %arg0, %c3_i32_7 : i32
    %c0_i32_8 = arith.constant 0 : i32
    %18 = arith.addi %17, %c0_i32_8 : i32
    %19 = arith.index_cast %18 : i32 to index
    %20 = memref.load %arg4[%19] : memref<6xf32, #tpu.memory_space<smem>>
    %cst_9 = arith.constant 1.000000e+00 : f32
    %21 = arith.subf %cst_9, %3 : f32
    %22 = arith.mulf %21, %16 : f32
    %23 = vector.extract_strided_slice %11 {offsets = [0, 0, 0, 0], sizes = [1, 3, 16, 16], strides = [1, 1, 1, 1]} : vector<3x3x16x16xf32> to vector<1x3x16x16xf32>
    %24 = vector.shape_cast %23 : vector<1x3x16x16xf32> to vector<3x16x16xf32>
    %25 = vector.broadcast %3 : f32 to vector<3x16x16xf32>
    %26 = arith.mulf %25, %24 : vector<3x16x16xf32>
    %27 = vector.broadcast %22 : f32 to vector<3x16x16xf32>
    %28 = arith.addf %27, %26 : vector<3x16x16xf32>
    %cst_10 = arith.constant 0.000000e+00 : f32
    %cst_11 = arith.constant 1.000000e+00 : f32
    %29 = vector.broadcast %cst_10 : f32 to vector<3x16x16xf32>
    %30 = arith.maximumf %29, %28 : vector<3x16x16xf32>
    %31 = vector.broadcast %cst_11 : f32 to vector<3x16x16xf32>
    %32 = arith.minimumf %31, %30 : vector<3x16x16xf32>
    %cst_12 = arith.constant 1.000000e-30 : f32
    %33 = vector.broadcast %cst_12 : f32 to vector<3x16x16xf32>
    %34 = arith.maximumf %32, %33 : vector<3x16x16xf32>
    %35 = math.log %34 : vector<3x16x16xf32>
    %36 = vector.broadcast %20 : f32 to vector<3x16x16xf32>
    %37 = arith.mulf %36, %35 : vector<3x16x16xf32>
    %38 = math.exp %37 : vector<3x16x16xf32>
    %cst_13 = arith.constant 0.000000e+00 : f32
    %39 = vector.broadcast %cst_13 : f32 to vector<3x16x16xf32>
    %40 = arith.cmpf ogt, %32, %39 : vector<3x16x16xf32>
    %cst_14 = arith.constant 1.000000e+00 : f32
    %41 = vector.broadcast %cst_14 : f32 to vector<3x16x16xf32>
    %42 = arith.minimumf %38, %41 : vector<3x16x16xf32>
    %cst_15 = arith.constant 0.000000e+00 : f32
    %43 = vector.broadcast %cst_15 : f32 to vector<3x16x16xf32>
    %44 = arith.select %40, %42, %43 : vector<3x16x16xi1>, vector<3x16x16xf32>
    %45 = vector.shape_cast %12 : vector<16x16xf32> to vector<1x16x16xf32>
    %46 = vector.broadcast %45 : vector<1x16x16xf32> to vector<3x16x16xf32>
    %47 = arith.mulf %44, %46 : vector<3x16x16xf32>
    %c3_i32_16 = arith.constant 3 : i32
    %48 = arith.muli %arg0, %c3_i32_16 : i32
    %c1_i32 = arith.constant 1 : i32
    %49 = arith.addi %48, %c1_i32 : i32
    %50 = arith.index_cast %49 : i32 to index
    %51 = memref.load %arg5[%50] : memref<6xf32, #tpu.memory_space<smem>>
    %c3_i32_17 = arith.constant 3 : i32
    %52 = arith.muli %arg0, %c3_i32_17 : i32
    %c1_i32_18 = arith.constant 1 : i32
    %53 = arith.addi %52, %c1_i32_18 : i32
    %54 = arith.index_cast %53 : i32 to index
    %55 = memref.load %arg4[%54] : memref<6xf32, #tpu.memory_space<smem>>
    %cst_19 = arith.constant 1.000000e+00 : f32
    %56 = arith.subf %cst_19, %3 : f32
    %57 = arith.mulf %56, %51 : f32
    %58 = vector.extract_strided_slice %11 {offsets = [1, 0, 0, 0], sizes = [1, 3, 16, 16], strides = [1, 1, 1, 1]} : vector<3x3x16x16xf32> to vector<1x3x16x16xf32>
    %59 = vector.shape_cast %58 : vector<1x3x16x16xf32> to vector<3x16x16xf32>
    %60 = vector.broadcast %3 : f32 to vector<3x16x16xf32>
    %61 = arith.mulf %60, %59 : vector<3x16x16xf32>
    %62 = vector.broadcast %57 : f32 to vector<3x16x16xf32>
    %63 = arith.addf %62, %61 : vector<3x16x16xf32>
    %cst_20 = arith.constant 0.000000e+00 : f32
    %cst_21 = arith.constant 1.000000e+00 : f32
    %64 = vector.broadcast %cst_20 : f32 to vector<3x16x16xf32>
    %65 = arith.maximumf %64, %63 : vector<3x16x16xf32>
    %66 = vector.broadcast %cst_21 : f32 to vector<3x16x16xf32>
    %67 = arith.minimumf %66, %65 : vector<3x16x16xf32>
    %cst_22 = arith.constant 1.000000e-30 : f32
    %68 = vector.broadcast %cst_22 : f32 to vector<3x16x16xf32>
    %69 = arith.maximumf %67, %68 : vector<3x16x16xf32>
    %70 = math.log %69 : vector<3x16x16xf32>
    %71 = vector.broadcast %55 : f32 to vector<3x16x16xf32>
    %72 = arith.mulf %71, %70 : vector<3x16x16xf32>
    %73 = math.exp %72 : vector<3x16x16xf32>
    %cst_23 = arith.constant 0.000000e+00 : f32
    %74 = vector.broadcast %cst_23 : f32 to vector<3x16x16xf32>
    %75 = arith.cmpf ogt, %67, %74 : vector<3x16x16xf32>
    %cst_24 = arith.constant 1.000000e+00 : f32
    %76 = vector.broadcast %cst_24 : f32 to vector<3x16x16xf32>
    %77 = arith.minimumf %73, %76 : vector<3x16x16xf32>
    %cst_25 = arith.constant 0.000000e+00 : f32
    %78 = vector.broadcast %cst_25 : f32 to vector<3x16x16xf32>
    %79 = arith.select %75, %77, %78 : vector<3x16x16xi1>, vector<3x16x16xf32>
    %c3_i32_26 = arith.constant 3 : i32
    %80 = arith.muli %arg0, %c3_i32_26 : i32
    %c2_i32 = arith.constant 2 : i32
    %81 = arith.addi %80, %c2_i32 : i32
    %82 = arith.index_cast %81 : i32 to index
    %83 = memref.load %arg5[%82] : memref<6xf32, #tpu.memory_space<smem>>
    %c3_i32_27 = arith.constant 3 : i32
    %84 = arith.muli %arg0, %c3_i32_27 : i32
    %c2_i32_28 = arith.constant 2 : i32
    %85 = arith.addi %84, %c2_i32_28 : i32
    %86 = arith.index_cast %85 : i32 to index
    %87 = memref.load %arg4[%86] : memref<6xf32, #tpu.memory_space<smem>>
    %cst_29 = arith.constant 1.000000e+00 : f32
    %88 = arith.subf %cst_29, %3 : f32
    %89 = arith.mulf %88, %83 : f32
    %90 = vector.extract_strided_slice %11 {offsets = [2, 0, 0, 0], sizes = [1, 3, 16, 16], strides = [1, 1, 1, 1]} : vector<3x3x16x16xf32> to vector<1x3x16x16xf32>
    %91 = vector.shape_cast %90 : vector<1x3x16x16xf32> to vector<3x16x16xf32>
    %92 = vector.broadcast %3 : f32 to vector<3x16x16xf32>
    %93 = arith.mulf %92, %91 : vector<3x16x16xf32>
    %94 = vector.broadcast %89 : f32 to vector<3x16x16xf32>
    %95 = arith.addf %94, %93 : vector<3x16x16xf32>
    %cst_30 = arith.constant 0.000000e+00 : f32
    %cst_31 = arith.constant 1.000000e+00 : f32
    %96 = vector.broadcast %cst_30 : f32 to vector<3x16x16xf32>
    %97 = arith.maximumf %96, %95 : vector<3x16x16xf32>
    %98 = vector.broadcast %cst_31 : f32 to vector<3x16x16xf32>
    %99 = arith.minimumf %98, %97 : vector<3x16x16xf32>
    %cst_32 = arith.constant 1.000000e-30 : f32
    %100 = vector.broadcast %cst_32 : f32 to vector<3x16x16xf32>
    %101 = arith.maximumf %99, %100 : vector<3x16x16xf32>
    %102 = math.log %101 : vector<3x16x16xf32>
    %103 = vector.broadcast %87 : f32 to vector<3x16x16xf32>
    %104 = arith.mulf %103, %102 : vector<3x16x16xf32>
    %105 = math.exp %104 : vector<3x16x16xf32>
    %cst_33 = arith.constant 0.000000e+00 : f32
    %106 = vector.broadcast %cst_33 : f32 to vector<3x16x16xf32>
    %107 = arith.cmpf ogt, %99, %106 : vector<3x16x16xf32>
    %cst_34 = arith.constant 1.000000e+00 : f32
    %108 = vector.broadcast %cst_34 : f32 to vector<3x16x16xf32>
    %109 = arith.minimumf %105, %108 : vector<3x16x16xf32>
    %cst_35 = arith.constant 0.000000e+00 : f32
    %110 = vector.broadcast %cst_35 : f32 to vector<3x16x16xf32>
    %111 = arith.select %107, %109, %110 : vector<3x16x16xi1>, vector<3x16x16xf32>
    %112 = vector.shape_cast %47 : vector<3x16x16xf32> to vector<1x3x16x16xf32>
    %113 = vector.shape_cast %79 : vector<3x16x16xf32> to vector<1x3x16x16xf32>
    %114 = vector.shape_cast %111 : vector<3x16x16xf32> to vector<1x3x16x16xf32>
    %115 = tpu.concatenate %112, %113, %114 in 0 : vector<1x3x16x16xf32>, vector<1x3x16x16xf32>, vector<1x3x16x16xf32> -> vector<3x3x16x16xf32>
    %c0_36 = arith.constant 0 : index
    %c0_37 = arith.constant 0 : index
    %c0_38 = arith.constant 0 : index
    %c0_39 = arith.constant 0 : index
    %c0_40 = arith.constant 0 : index
    %116 = vector.load %arg8[%c0_36, %c0_37, %c0_38, %c0_39, %c0_40] : memref<1x3x3x16x16xf32, #tpu.memory_space<vmem>>, vector<1x3x3x16x16xf32>
    %117 = vector.shape_cast %116 : vector<1x3x3x16x16xf32> to vector<3x3x16x16xf32>
    %118 = vector.shape_cast %115 : vector<3x3x16x16xf32> to vector<1x3x3x16x16xf32>
    tpu.vector_store %arg8[%c0_36, %c0_37, %c0_38, %c0_39, %c0_40], %118 {strides = array<i32>} : memref<1x3x3x16x16xf32, #tpu.memory_space<vmem>>, vector<1x3x3x16x16xf32>,
    return
  }
  func.func @transform_0(%arg0: i32, %arg1: i32) -> i32 {
    %c0_i32 = arith.constant 0 : i32
    %c0_i32_0 = arith.constant 0 : i32
    return %c0_i32 : i32
  }
  func.func @transform_1(%arg0: i32, %arg1: i32) -> i32 {
    %c0_i32 = arith.constant 0 : i32
    %c0_i32_0 = arith.constant 0 : i32
    return %c0_i32 : i32
  }
  func.func @transform_2(%arg0: i32, %arg1: i32) -> i32 {
    %c0_i32 = arith.constant 0 : i32
    %c0_i32_0 = arith.constant 0 : i32
    return %c0_i32 : i32
  }
  func.func @transform_3(%arg0: i32, %arg1: i32) -> i32 {
    %c0_i32 = arith.constant 0 : i32
    %c0_i32_0 = arith.constant 0 : i32
    return %c0_i32 : i32
  }
  func.func @transform_4(%arg0: i32, %arg1: i32) -> (i32, i32) {
    %c0_i32 = arith.constant 0 : i32
    %c0_i32_0 = arith.constant 0 : i32
    return %arg1, %c0_i32 : i32, i32
  }
  func.func @transform_5(%arg0: i32, %arg1: i32) -> (i32, i32, i32, i32, i32) {
    %c0_i32 = arith.constant 0 : i32
    %c0_i32_0 = arith.constant 0 : i32
    %c0_i32_1 = arith.constant 0 : i32
    %c0_i32_2 = arith.constant 0 : i32
    return %arg0, %c0_i32, %c0_i32_0, %arg1, %c0_i32_1 : i32, i32, i32, i32, i32
  }
  func.func @transform_6(%arg0: i32, %arg1: i32) -> (i32, i32, i32, i32, i32) {
    %c0_i32 = arith.constant 0 : i32
    %c0_i32_0 = arith.constant 0 : i32
    %c0_i32_1 = arith.constant 0 : i32
    %c0_i32_2 = arith.constant 0 : i32
    return %arg0, %c0_i32, %c0_i32_0, %arg1, %c0_i32_1 : i32, i32, i32, i32, i32
  }
}

</mosaic_0001>

<bundles_post_ra>
// kernel: tpu_custom_call.1
= control target key start
LH: loop header
LB: loop body
LE: loop exit
PB: predicated region body
PF: predicated region fallthrough
CT: control target
= control target key end

     0   :  { %s1840_s0 = inlined_call_operand.hbm [shape: f32[2], index: 0, kind: input, shape index: {}]   ;;  %s1841_s1 = inlined_call_operand.vmem [shape: f32[2], index: 1, kind: input, shape index: {}]   ;;  %s1842_s2 = inlined_call_operand.vmem [shape: f32[6], index: 2, kind: input, shape index: {}]   ;;  %s1843_s3 = inlined_call_operand.vmem [shape: f32[6], index: 3, kind: input, shape index: {}]   ;;  %s1844_s4 = inlined_call_operand.hbm [shape: f32[16,16], index: 4, kind: input, shape index: {}]   ;;  %s1845_s5 = inlined_call_operand.hbm [shape: f32[2,3,3,16,16], index: 5, kind: input, shape index: {}]   ;;  %s1846_s6 = inlined_call_operand.hbm [shape: f32[2,3,3,16,16], index: 6, kind: output, shape index: {}]  }
   0x1   :  { %1849 = sst [smem:[#allocation21_spill]] %s1840_s0 }
   0x2   :  { %1850 = sst [smem:[#allocation22_spill]] %s1841_s1 }
   0x3   :  { %1851 = sst [smem:[#allocation23_spill]] %s1842_s2 }
   0x4   :  { %11 = vsyncpa [#allocation5], 0 }
   0x5   :  { %12 = vsyncpa [#allocation6], 0 }
   0x6   :  { %13 = vsyncpa [#allocation9], 0 }
   0x7   :  { %14 = vsyncpa [#allocation3], 0 }
   0x8   :  { %15 = vsyncpa [#allocation13], 0 }
   0x9   :  { %17 = vsyncpa [#allocation13 + $0x1], 0 }
   0xa   :  { %18 = vsyncpa [#allocation4], 0 }
   0xb   :  { %20 = vsyncpa [#allocation4 + $0x1], 0  ;;  %s1346_s21 = smov 0   ;;  %s1348_s22 = smov 0  }
   0xc   :  { %s1350_s23 = smov 0   ;;  %s1352_s24 = smov 0  }
   0xd   :  { %s1354_s25 = smov 0   ;;  %s1356_s26 = smov 0  }
   0xe LB: > { %s1852_s2 = sld [smem:[#allocation23_spill]]  ;;  %s880_s30 = sadd.s32 4294967295, %s1298_s26   ;;  %s1298_s26 = sphi %s1356_s26, %s26_s26   ;;  %s1294_s25 = sphi %s1354_s25, %s1870_s25   ;;  %s1290_s24 = sphi %s1352_s24, %s1869_s24   ;;  %s1286_s23 = sphi %s1350_s23, %s1868_s23   ;;  %s1282_s22 = sphi %s1348_s22, %s1867_s22   ;;  %s1278_s21 = sphi %s1346_s21, %s1866_s21  }
   0xf   : > { %p882_p0 = scmp.ge.s32.totalorder %s1298_s26, 1  ;;  %p1383_p1 = scmp.eq.s32.totalorder %s880_s30, 0 }
  0x10   : > { %p209_p2 = scmp.lt.s32.totalorder %s1298_s26, 3  ;;  %s1855_s1 = sld [smem:[#allocation22_spill]] }
  0x11   : > { %s253_s15 = sshll.u32 %s1843_s3, 4  ;;  %s1407_s15 = int_to_ptr.vmem [resolvable:$true] %s253_s15 }
  0x12   : > { %p1388_p3 = pnand %p882_p0, %p209_p2 }
  0x14   : > { %s242_s29 = sshll.u32 %s1852_s2, 4  ;;  %p927_p5 = pneg %p1388_p3  ;;  %s243_s29 = int_to_ptr.vmem [resolvable:$true] %s242_s29 }
  0x15   : > { %s1092_s16 = scalar_lea.vmem %s243_s29, 16  ;;  %p1100_p11 = scmp.lt.s32.totalorder %s243_s29, %s243_s29 }
  0x16   : > { %s231_s11 = sshll.u32 %s1855_s1, 4  ;;  %p1400_p6 = pnand %p927_p5, %p1383_p1  ;;  %s232_s11 = int_to_ptr.vmem [resolvable:$true] %s231_s11 }
  0x17   : > { %p1093_p7 = scmp.ne.s32.totalorder %s243_s29, %s1092_s16  ;;  %p1101_p12 = scmp.lt.s32.totalorder %s1092_s16, %s1092_s16 }
  0x18   : > { %p1094_p8 = pneg %p1400_p6 }
  0x19   : > { %p1102_p13 = por %p1101_p12, %p1100_p11 }
  0x1a   : > { %p1095_p9 = pnand %p1094_p8, %p1093_p7 }
  0x1c   : > { %p1096_p10 = pneg %p1095_p9 }
  0x1e   : > { %p1103_p0 = pnand %p1102_p13, %p1096_p10 }
  0x20   : > { %1106 = shalt.err (!%p1103_p0)
}
  0x21   : > { %s1300_s17 = smov [#allocation8]   ;;  %s1301_s18 = smov [#allocation2]  }
  0x22   : > { %936 = dma.vmem_to_smem (!%p1400_p6), %s243_s29, 16, %s1300_s17, [#allocation9]  }
  0x23   : > { %s1857_s0 = sld [smem:[#allocation21_spill]]  ;;  %s1118_s27 = scalar_lea.vmem %s232_s11, 16 }
  0x24   : > { %p1119_p2 = scmp.ne.s32.totalorder %s232_s11, %s1118_s27  ;;  %p1126_p9 = scmp.lt.s32.totalorder %s232_s11, %s232_s11 }
  0x25   : > { %p1127_p10 = scmp.lt.s32.totalorder %s1118_s27, %s1118_s27 }
  0x26   : > { %p1121_p5 = pnand %p1119_p2, %p1094_p8 }
  0x27   : > { %p1128_p11 = por %p1127_p10, %p1126_p9 }
  0x28   : > { %p1122_p7 = pneg %p1121_p5 }
  0x29   : > { %930 = dma.hbm_to_smem (!%p1400_p6), %s1857_s0, 16, %s1301_s18, [#allocation5]  }
  0x2a   : > { %p1129_p12 = pnand %p1128_p11, %p1122_p7 }
  0x2c   : > { %1132 = shalt.err (!%p1129_p12)
}
  0x2d   : > { %s1302_s28 = smov [#allocation7]   ;;  %s1133_s29 = scalar_lea.vmem %s1407_s15, 16 }
  0x2e   : > { %933 = dma.vmem_to_smem (!%p1400_p6), %s232_s11, 16, %s1302_s28, [#allocation6]  }
  0x2f   : > { %p1134_p13 = scmp.ne.s32.totalorder %s1407_s15, %s1133_s29  ;;  %p1141_p5 = scmp.lt.s32.totalorder %s1407_s15, %s1407_s15 }
  0x30   : > { %p1142_p4 = scmp.lt.s32.totalorder %s1133_s29, %s1133_s29 }
  0x31   : > { %p1136_p0 = pnand %p1134_p13, %p1094_p8 }
  0x32   : > { %p1143_p9 = por %p1142_p4, %p1141_p5 }
  0x33   : > { %p1137_p2 = pneg %p1136_p0 }
  0x35   : > { %p1144_p7 = pnand %p1143_p9, %p1137_p2 }
  0x37   : > { %1147 = shalt.err (!%p1144_p7)
}
  0x38   : > { %s1303_s9 = smov [#allocation10]   ;;  %s1304_s10 = smov [#allocation11]  }
  0x39   : > { %939 = dma.vmem_to_smem (!%p1400_p6), %s1407_s15, 16, %s1303_s9, [#allocation9]  }
  0x3a   : > { %s266_s11 = sshll.u32 %s1304_s10, 4  ;;  %s267_s11 = int_to_ptr.vmem [resolvable:$true] %s266_s11 }
  0x3b   : > { %s1159_s13 = scalar_lea.vmem %s267_s11, 256  ;;  %p1167_p13 = scmp.lt.s32.totalorder %s267_s11, %s267_s11 }
  0x3c   : > { %p1160_p10 = scmp.ne.s32.totalorder %s267_s11, %s1159_s13  ;;  %p1168_p0 = scmp.lt.s32.totalorder %s1159_s13, %s1159_s13 }
  0x3e   : > { %p1162_p11 = pnand %p1160_p10, %p1094_p8  ;;  %p1169_p4 = por %p1168_p0, %p1167_p13 }
  0x40   : > { %p1163_p12 = pneg %p1162_p11 }
  0x42   : > { %p1170_p2 = pnand %p1169_p4, %p1163_p12 }
  0x44   : > { %1173 = shalt.err (!%p1170_p2)
}
  0x45   : > { %s1847_s14 = smov 128   ;;  %s1848_s15 = smov 8  }
  0x46   : > { %942 = dma.hbm_to_vmem [thread:$0]  (!%p1400_p6), %s1844_s4, 256, %s267_s11, [#allocation3], %s1847_s14, %s1847_s14, %s1848_s15  }
  0x47   : > { %s881_s18 = sadd.s32 4294967294, %s1298_s26   ;;  %s38_s19 = sadd.s32 1, %s1294_s25 }
  0x48   : > { %s157_s20 = sadd.s32 1, %s1286_s23  ;;  %p40_p8 = scmp.ge.s32.totalorder %s38_s19, 2 }
  0x49   : > { %p164_p5 = scmp.ne.s32.totalorder %s1286_s23, %s1282_s22  ;;  %p165_p9 = scmp.eq.s32.totalorder %s1298_s26, 0 }
  0x4a   : > { %p170_p7 = scmp.ne.s32.totalorder %s1282_s22, %s1278_s21  ;;  %s1872_s19 = smov (%p40_p8, %s38_s19), 0 }
  0x4b   : > { %p1457_p10 = por %p165_p9, %p164_p5  ;;  %s152_s28 = ssub.s32 %s1294_s25, %s1872_s19 }
  0x4c   : > { %p1463_p6 = por %p1383_p1, %p170_p7  ;;  %p196_p11 = scmp.eq.s32.totalorder %s880_s30, 1 }
  0x4d   : > { %p155_p12 = scmp.eq.s32.totalorder %s152_s28, 0  ;;  %p202_p13 = scmp.eq.s32.totalorder %s881_s18, 1 }
  0x4e   : > { %p1471_p0 = por %p196_p11, %p164_p5  ;;  %p956_p4 = scmp.lt.s32.totalorder %s1298_s26, 2 }
  0x4f   : > { %s1477_s9 = scalar_select %p155_p12, %s1286_s23, %s157_s20  }
  0x50   : > { %p1479_p2 = por %p202_p13, %p170_p7  ;;  %s280_s11 = sand.u32 1, %s1286_s23  }
  0x51   : > { %s899_s13 = smul.u32 144, %s280_s11  ;;  %p1487_p8 = pnand %p956_p4, %p1457_p10 }
  0x52   : > { %s900_s16 = smul.u32 2304, %s1294_s25  ;;  %s281_s15 = scalar_lea.sflag [#allocation13], %s280_s11 }
  0x53   : > { %s284_s14 = scalar_lea.vmem [#allocation12], %s899_s13  ;;  %p1176_p5 = pneg %p1487_p8 }
  0x54   : > { %s292_s28 = scalar_lea.hbm %s1845_s5, %s900_s16  ;;  %s293_s20 = sshll.u32 %s284_s14, 4  ;;  %s294_s20 = int_to_ptr.vmem [resolvable:$true] %s293_s20 }
  0x55   : > { %s1187_s0 = scalar_lea.vmem %s294_s20, 2304  ;;  %s1307_s12 = smov [#allocation12]  }
  0x56   : > { %p1188_p9 = scmp.ne.s32.totalorder %s294_s20, %s1187_s0  ;;  %s1192_s1 = sshll.u32 %s1307_s12, 4  ;;  %s1193_s1 = int_to_ptr.vmem [resolvable:$false] %s1192_s1 }
  0x57   : > { %s1194_s2 = scalar_lea.vmem %s1193_s1, 4608  ;;  %p1195_p10 = scmp.lt.s32.totalorder %s294_s20, %s1193_s1 }
  0x58   : > { %p1190_p7 = pnand %p1188_p9, %p1176_p5  ;;  %p1196_p12 = scmp.lt.s32.totalorder %s1194_s2, %s1187_s0 }
  0x5a   : > { %p1191_p11 = pneg %p1190_p7  ;;  %p1197_p13 = por %p1196_p12, %p1195_p10 }
  0x5c   : > { %p1198_p4 = pnand %p1197_p13, %p1191_p11 }
  0x5e   : > { %1201 = shalt.err (!%p1198_p4)
}
  0x5f   : > { %s1863_s14 = smov 8   ;;  %s1864_s13 = smov 128  }
  0x60   : > { %946 = dma.hbm_to_vmem [thread:$0]  (!%p1487_p8), %s292_s28, 2304, %s294_s20, %s281_s15, %s1864_s13, %s1864_s13, %s1863_s14  }
  0x61   : > { %305 = sbr.rel (%p1388_p3) target bundleno = 242 (0xf2), region = 44 }
  0x66   : > { %1253 = dma.done.wait (%p1383_p1), [#allocation5], 16  }
  0x67   : > { %1255 = vsyncadd (%p1383_p1), [#allocation5], 4294967280 }
  0x68   : > { %1257 = dma.done.wait (%p1383_p1), [#allocation6], 16  }
  0x69   : > { %1259 = vsyncadd (%p1383_p1), [#allocation6], 4294967280 }
  0x6a   : > { %1261 = dma.done.wait (%p1383_p1), [#allocation9], 32  }
  0x6b   : > { %1263 = vsyncadd (%p1383_p1), [#allocation9], 4294967264 }
  0x6c   : > { %1265 = dma.done.wait (%p1383_p1), [#allocation3], 256  }
  0x6d   : > { %1267 = vsyncadd (%p1383_p1), [#allocation3], 4294967040  ;;  %s1520_s0 = sand.u32 1, %s1282_s22  }
  0x6e   : > { %s901_s1 = smul.u32 144, %s1520_s0  ;;  %s328_s2 = scalar_lea.sflag [#allocation13], %s1520_s0 }
  0x70   : > { %s1526_s8 = scalar_lea.vmem [#allocation12], %s901_s1 }
  0x71   : > { %1269 = dma.done.wait (%p1463_p6), %s328_s2, 2304  }
  0x72   : > { %1271 = vsyncadd (%p1463_p6), %s328_s2, 4294964992 }
  0x73   : > { %336 = sfence }
  0x74   : > { %s364_s7 = sld [smem:[#allocation2 + %s1290_s24]]  ;;  %s1535_s11 = smul.u32 3, %s1290_s24  ;;  %v366_v0 = vld [vmem:[%s1526_s8] sm:$0xff]  ;;  %v367_v1 = vld [vmem:[%s1526_s8 + $0x8] sm:$0xff]  ;;  %v368_v2 = vld [vmem:[%s1526_s8 + $0x10] sm:$0xff]  ;;  %vm701_vm3 = vcmask 130048  }
  0x75   : > { %s365_s15 = sld [smem:[#allocation7 + %s1290_s24]]  ;;  %v369_v3 = vld [vmem:[%s1526_s8 + $0x18] sm:$0xff]  ;;  %v370_v4 = vld [vmem:[%s1526_s8 + $0x20] sm:$0xff]  ;;  %v371_v5 = vld [vmem:[%s1526_s8 + $0x28] sm:$0xff] }
  0x76   : > { %s442_s27 = sld [smem:[#allocation10 + %s1535_s11]]  ;;  %s533_s16 = sadd.s32 1, %s1535_s11  ;;  %v372_v6 = vld [vmem:[%s1526_s8 + $0x30] sm:$0xff]  ;;  %v373_v22 = vld [vmem:[%s1526_s8 + $0x38] sm:$0xff] }
  0x77   : > { %s1548_s17 = sld [smem:[#allocation10 + %s533_s16]]  ;;  %s617_s20 = sadd.s32 2, %s1535_s11 }
  0x78   : > { %s1593_s12 = sld [smem:[#allocation10 + %s617_s20]] }
  0x79   : > { %s1615_s14 = sld [smem:[#allocation8 + %s1535_s11]] }
  0x7a   : > { %v1550_v7 = vstv %s364_s7  ;;  %s1623_s2 = sld [smem:[#allocation8 + %s533_s16]] }
  0x7b   : > { %v385_v8 = vmul.f32 %v1550_v7, %v366_v0  ;;  %s1553_s30 = ssub.f32 1.0, %s365_s15  ;;  %v386_v9 = vmul.f32 %v1550_v7, %v367_v1  ;;  %v387_v10 = vmul.f32 %v1550_v7, %v368_v2  ;;  %v388_v11 = vmul.f32 %v1550_v7, %v369_v3  ;;  %v374_v1 = vld [vmem:[%s1526_s8 + $0x40] sm:$0xff] }
  0x7c   : > { %v389_v12 = vmul.f32 %v1550_v7, %v370_v4  ;;  %v390_v13 = vmul.f32 %v1550_v7, %v371_v5  ;;  %v391_v14 = vmul.f32 %v1550_v7, %v372_v6  ;;  %v1562_v18 = vstv %s365_s15  ;;  %v375_v4 = vld [vmem:[%s1526_s8 + $0x48] sm:$0xff]  ;;  %v376_v5 = vld [vmem:[%s1526_s8 + $0x50] sm:$0xff]  ;;  %s1671_s7 = sld [smem:[#allocation8 + %s617_s20]] }
  0x7d   : > { %v403_v15 = vmax.f32 %v385_v8, 0.0  ;;  %s445_s18 = smul.f32 %s1553_s30, %s442_s27  ;;  %v404_v16 = vmax.f32 %v386_v9, 0.0  ;;  %v405_v17 = vmax.f32 %v387_v10, 0.0  ;;  %v406_v19 = vmax.f32 %v388_v11, 0.0 }
  0x7e   : > { %v407_v20 = vmax.f32 %v389_v12, 0.0  ;;  %v408_v21 = vmax.f32 %v390_v13, 0.0  ;;  %s536_s28 = smul.f32 %s1548_s17, %s1553_s30  ;;  %v409_v30 = vmax.f32 %v391_v14, 0.0  ;;  %v392_v34 = vmul.f32 %v1550_v7, %v373_v22  ;;  %v377_v14 = vld [vmem:[%s1526_s8 + $0x58] sm:$0xff] }
  0x7f   : > { %v421_v23 = vmin.f32 %v403_v15, 1.0  ;;  %v453_v24 = vstv %s445_s18  ;;  %v422_v25 = vmin.f32 %v404_v16, 1.0  ;;  %v423_v26 = vmin.f32 %v405_v17, 1.0  ;;  %v378_v15 = vld [vmem:[%s1526_s8 + $0x60] sm:$0xff]  ;;  %s620_s13 = smul.f32 %s1593_s12, %s1553_s30  ;;  %s1308_s30 = smov [#allocation14]  }
  0x80   : > { %v424_v27 = vmin.f32 %v406_v19, 1.0  ;;  %v425_v28 = vmin.f32 %v407_v20, 1.0  ;;  %v426_v29 = vmin.f32 %v408_v21, 1.0  ;;  %v427_v38 = vmin.f32 %v409_v30, 1.0  ;;  %s1206_s18 = sshll.u32 %s1308_s30, 4  ;;  %s1207_s18 = int_to_ptr.vmem [resolvable:$false] %s1206_s18 }
  0x81   : > { %v447_v31 = vmul.f32 %v1562_v18, %v421_v23  ;;  %v448_v32 = vmul.f32 %v1562_v18, %v422_v25  ;;  %v449_v33 = vmul.f32 %v1562_v18, %v423_v26  ;;  %v1574_v42 = vstv %s536_s28  ;;  %s1208_s28 = scalar_lea.vmem %s1207_s18, 4608 }
  0x82   : > { %v450_v35 = vmul.f32 %v1562_v18, %v424_v27  ;;  %v451_v36 = vmul.f32 %v1562_v18, %v425_v28  ;;  %v452_v37 = vmul.f32 %v1562_v18, %v426_v29  ;;  %v537_v46 = vmul.f32 %v1562_v18, %v427_v38 }
  0x83   : > { %v454_v39 = vadd.f32 %v453_v24, %v447_v31  ;;  %v455_v40 = vadd.f32 %v453_v24, %v448_v32  ;;  %v456_v41 = vadd.f32 %v453_v24, %v449_v33  ;;  %v410_v50 = vmax.f32 %v392_v34, 0.0  ;;  %v379_v31 = vld [vmem:[%s1526_s8 + $0x68] sm:$0xff] }
  0x84   : > { %v457_v43 = vadd.f32 %v453_v24, %v450_v35  ;;  %v458_v44 = vadd.f32 %v453_v24, %v451_v36  ;;  %v459_v45 = vadd.f32 %v453_v24, %v452_v37  ;;  %v544_v54 = vadd.f32 %v1574_v42, %v537_v46  ;;  %v380_v35 = vld [vmem:[%s1526_s8 + $0x70] sm:$0xff] }
  0x85   : > { %v460_v47 = vmax.f32 %v454_v39, 0.0  ;;  %v461_v48 = vmax.f32 %v455_v40, 0.0  ;;  %v462_v49 = vmax.f32 %v456_v41, 0.0  ;;  %v428_v58 = vmin.f32 %v410_v50, 1.0 }
  0x86   : > { %v463_v51 = vmax.f32 %v457_v43, 0.0  ;;  %v464_v52 = vmax.f32 %v458_v44, 0.0  ;;  %v465_v53 = vmax.f32 %v459_v45, 0.0  ;;  %v550_v62 = vmax.f32 %v544_v54, 0.0 }
  0x87   : > { %v1579_v55 = vmin.f32 %v460_v47, 1.0  ;;  %v1581_v56 = vmin.f32 %v461_v48, 1.0  ;;  %v1583_v57 = vmin.f32 %v462_v49, 1.0  ;;  %v538_v10 = vmul.f32 %v1562_v18, %v428_v58 }
  0x88   : > { %v1585_v59 = vmin.f32 %v463_v51, 1.0  ;;  %v1587_v60 = vmin.f32 %v464_v52, 1.0  ;;  %v1589_v61 = vmin.f32 %v465_v53, 1.0  ;;  %v1604_v9 = vmin.f32 %v550_v62, 1.0 }
  0x89   : > { %v472_v63 = vmax.f32 %v1579_v55, 1e-30  ;;  %v473_v0 = vmax.f32 %v1581_v56, 1e-30  ;;  %v474_v2 = vmax.f32 %v1583_v57, 1e-30  ;;  %v393_v11 = vmul.f32 %v1550_v7, %v374_v1 }
  0x8a   : > { %v475_v3 = vmax.f32 %v1585_v59, 1e-30  ;;  %v476_v6 = vmax.f32 %v1587_v60, 1e-30  ;;  %v477_v8 = vmax.f32 %v1589_v61, 1e-30  ;;  %v394_v12 = vmul.f32 %v1550_v7, %v375_v4 }
  0x8b   : > { %1020 = vlog2.f32 %v472_v63  ;;  %v395_v13 = vmul.f32 %v1550_v7, %v376_v5  ;;  %v562_v16 = vmax.f32 %v1604_v9, 1e-30  ;;  %v545_v17 = vadd.f32 %v1574_v42, %v538_v10 }
  0x8c   : > { %1022 = vlog2.f32 %v473_v0  ;;  %v411_v19 = vmax.f32 %v393_v11, 0.0  ;;  %v412_v20 = vmax.f32 %v394_v12, 0.0  ;;  %v396_v23 = vmul.f32 %v1550_v7, %v377_v14 }
  0x8d   : > { %1024 = vlog2.f32 %v474_v2  ;;  %v413_v21 = vmax.f32 %v395_v13, 0.0  ;;  %v551_v22 = vmax.f32 %v545_v17, 0.0  ;;  %v397_v24 = vmul.f32 %v1550_v7, %v378_v15 }
  0x8e   : > { %1026 = vlog2.f32 %v475_v3  ;;  %v429_v25 = vmin.f32 %v411_v19, 1.0  ;;  %v430_v26 = vmin.f32 %v412_v20, 1.0  ;;  %v414_v29 = vmax.f32 %v396_v23, 0.0 }
  0x8f   : > { %1028 = vlog2.f32 %v476_v6  ;;  %v431_v27 = vmin.f32 %v413_v21, 1.0  ;;  %v1625_v28 = vmin.f32 %v551_v22, 1.0  ;;  %v415_v30 = vmax.f32 %v397_v24, 0.0  ;;  %v381_v24 = vld [vmem:[%s1526_s8 + $0x78] sm:$0xff] }
  0x90   : > { %1030 = vlog2.f32 %v477_v8  ;;  %v539_v32 = vmul.f32 %v1562_v18, %v429_v25  ;;  %v540_v33 = vmul.f32 %v1562_v18, %v430_v26  ;;  %v432_v37 = vmin.f32 %v414_v29, 1.0 }
  0x91   : > { %1032 = vlog2.f32 %v562_v16  ;;  %v541_v34 = vmul.f32 %v1562_v18, %v431_v27  ;;  %v563_v36 = vmax.f32 %v1625_v28, 1e-30  ;;  %v433_v38 = vmin.f32 %v415_v30, 1.0 }
  0x92   : > { %v1633_v39 = vstv %s620_s13  ;;  %v546_v40 = vadd.f32 %v1574_v42, %v539_v32  ;;  %v547_v41 = vadd.f32 %v1574_v42, %v540_v33  ;;  %v398_v44 = vmul.f32 %v1550_v7, %v379_v31 }
  0x93   : > { %v548_v43 = vadd.f32 %v1574_v42, %v541_v34  ;;  %1034 = vlog2.f32 %v563_v36  ;;  %v542_v45 = vmul.f32 %v1562_v18, %v432_v37  ;;  %v621_v46 = vmul.f32 %v1562_v18, %v433_v38 }
  0x94   : > { %v399_v47 = vmul.f32 %v1550_v7, %v380_v35  ;;  %v552_v48 = vmax.f32 %v546_v40, 0.0  ;;  %v553_v49 = vmax.f32 %v547_v41, 0.0  ;;  %v490_v52 = vstv %s1615_s14 }
  0x95   : > { %v554_v50 = vmax.f32 %v548_v43, 0.0  ;;  %v549_v53 = vadd.f32 %v1574_v42, %v542_v45  ;;  %v628_v54 = vadd.f32 %v1633_v39, %v621_v46  ;;  %v416_v58 = vmax.f32 %v398_v44, 0.0 }
  0x96   : > { %v1646_v0 = vstv %s1623_s2  ;;  %v1648_v1 = vmin.f32 %v552_v48, 1.0  ;;  %v1650_v2 = vmin.f32 %v553_v49, 1.0  ;;  %v417_v8 = vmax.f32 %v399_v47, 0.0  ;;  %v382_v48 = vld [vmem:[%s1526_s8 + $0x80] sm:$0xff]  ;;  %v383_v49 = vld [vmem:[%s1526_s8 + $0x88] sm:$0xff]  ;;  %s1708_s8 = scalar_lea.vmem [#allocation14], %s901_s1 }
  0x97   : > { %v1652_v5 = vmin.f32 %v554_v50, 1.0  ;;  %v555_v6 = vmax.f32 %v549_v53, 0.0  ;;  %v634_v13 = vmax.f32 %v628_v54, 0.0  ;;  %v434_v19 = vmin.f32 %v416_v58, 1.0  ;;  %s902_s1 = smul.u32 2304, %s1290_s24  ;;  %s736_s15 = sshll.u32 %s1708_s8, 4  ;;  %s1790_s15 = int_to_ptr.vmem [resolvable:$true] %s736_s15 }
  0x98   : > { %v1021_v51 = vpop.eup %1020  ;;  %v564_v12 = vmax.f32 %v1648_v1, 1e-30  ;;  %v565_v17 = vmax.f32 %v1650_v2, 1e-30  ;;  %v400_v35 = vmul.f32 %v1550_v7, %v381_v24  ;;  %v435_v47 = vmin.f32 %v417_v8, 1.0  ;;  %s721_s24 = scalar_lea.sflag [#allocation4], %s1520_s0  ;;  %p1209_p8 = scmp.lt.s32.totalorder %s1790_s15, %s1207_s18 }
  0x99   : > { %v1023_v62 = vpop.eup %1022  ;;  %v479_v63 = vmul.f32 0.6931472, %v1021_v51  ;;  %v566_v38 = vmax.f32 %v1652_v5, 1e-30  ;;  %v1660_v41 = vmin.f32 %v555_v6, 1.0  ;;  %v1662_v43 = vmin.f32 %v634_v13, 1.0  ;;  %s1788_s16 = scalar_lea.hbm %s1846_s6, %s902_s1 }
  0x9a   : > { %v1025_v3 = vpop.eup %1024  ;;  %v481_v4 = vmul.f32 0.6931472, %v1023_v62  ;;  %1036 = vlog2.f32 %v564_v12  ;;  %v622_v46 = vmul.f32 %v1562_v18, %v434_v19  ;;  %vm509_vm0 = vcmp.gt.f32.partialorder %v1579_v55, 0.0  ;;  %s1202_s17 = scalar_lea.vmem %s1790_s15, 2304 }
  0x9b   : > { %v1027_v10 = vpop.eup %1026  ;;  %v491_v42 = vmul.f32 %v490_v52, %v479_v63  ;;  %v483_v11 = vmul.f32 0.6931472, %v1025_v3  ;;  %1038 = vlog2.f32 %v565_v17  ;;  %v567_v51 = vmax.f32 %v1660_v41, 1e-30  ;;  %p1203_p1 = scmp.ne.s32.totalorder %s1790_s15, %s1202_s17  ;;  %p1210_p5 = scmp.lt.s32.totalorder %s1208_s28, %s1202_s17 }
  0x9c   : > { %v1029_v14 = vpop.eup %1028  ;;  %v492_v15 = vmul.f32 %v490_v52, %v481_v4  ;;  %v485_v16 = vmul.f32 0.6931472, %v1027_v10  ;;  %vm510_vm1 = vcmp.gt.f32.partialorder %v1581_v56, 0.0  ;;  %v629_v53 = vadd.f32 %v1633_v39, %v622_v46 }
  0x9d   : > { %v1031_v20 = vpop.eup %1030  ;;  %v497_v21 = vmul.f32 1.442695, %v491_v42  ;;  %v493_v22 = vmul.f32 %v490_v52, %v483_v11  ;;  %v487_v23 = vmul.f32 0.6931472, %v1029_v14  ;;  %vm511_vm2 = vcmp.gt.f32.partialorder %v1583_v57, 0.0  ;;  %p1204_p3 = pnand %p1203_p1, %p1471_p0  ;;  %p1211_p9 = por %p1210_p5, %p1209_p8 }
  0x9e   : > { %v1033_v25 = vpop.eup %1032  ;;  %v499_v26 = vmul.f32 1.442695, %v492_v15  ;;  %v494_v27 = vmul.f32 %v490_v52, %v485_v16  ;;  %v489_v29 = vmul.f32 0.6931472, %v1031_v20  ;;  %v623_v58 = vmul.f32 %v1562_v18, %v435_v47 }
  0x9f   : > { %1040 = vpow2.f32 %v497_v21  ;;  %v501_v30 = vmul.f32 1.442695, %v493_v22  ;;  %v495_v31 = vmul.f32 %v490_v52, %v487_v23  ;;  %v569_v32 = vmul.f32 0.6931472, %v1033_v25  ;;  %p1205_p6 = pneg %p1204_p3 }
  0xa0   : > { %1042 = vpow2.f32 %v499_v26  ;;  %v503_v33 = vmul.f32 1.442695, %v494_v27  ;;  %v496_v34 = vmul.f32 %v490_v52, %v489_v29  ;;  %v1035_v44 = vpop.eup %1034  ;;  %v646_v52 = vmax.f32 %v1662_v43, 1e-30  ;;  %v439_v26 = vld [vmem:[#allocation11] sm:$0xff] }
  0xa1   : > { %1044 = vpow2.f32 %v501_v30  ;;  %v505_v36 = vmul.f32 1.442695, %v495_v31  ;;  %v581_v37 = vmul.f32 %v1646_v0, %v569_v32  ;;  %v571_v50 = vmul.f32 0.6931472, %v1035_v44  ;;  %v440_v32 = vld [vmem:[#allocation11 + $0x8] sm:$0xff]  ;;  %p1212_p7 = pnand %p1211_p9, %p1205_p6 }
  0xa2   : > { %1046 = vpow2.f32 %v503_v33  ;;  %v507_v40 = vmul.f32 1.442695, %v496_v34  ;;  %v418_v62 = vmax.f32 %v400_v35, 0.0  ;;  %vm512_vm4 = vcmp.gt.f32.partialorder %v1585_v59, 0.0 }
  0xa3   : > { %1048 = vpow2.f32 %v505_v36  ;;  %v587_v45 = vmul.f32 1.442695, %v581_v37  ;;  %v582_v54 = vmul.f32 %v1646_v0, %v571_v50  ;;  %v635_v63 = vmax.f32 %v629_v53, 0.0 }
  0xa4   : > { %1050 = vpow2.f32 %v507_v40  ;;  %v401_v3 = vmul.f32 %v1550_v7, %v382_v48  ;;  %v402_v4 = vmul.f32 %v1550_v7, %v383_v49  ;;  %v630_v8 = vadd.f32 %v1633_v39, %v623_v58 }
  0xa5   : > { %1052 = vpow2.f32 %v587_v45  ;;  %v589_v6 = vmul.f32 1.442695, %v582_v54  ;;  %v436_v10 = vmin.f32 %v418_v62, 1.0  ;;  %vm513_vm5 = vcmp.gt.f32.partialorder %v1587_v60, 0.0 }
  0xa6   : > { %1054 = vlog2.f32 %v566_v38  ;;  %v1684_v42 = vmin.f32 %v635_v63, 1.0  ;;  %v419_v11 = vmax.f32 %v401_v3, 0.0  ;;  %v420_v12 = vmax.f32 %v402_v4, 0.0 }
  0xa7   : > { %1056 = vlog2.f32 %v567_v51  ;;  %v1037_v13 = vpop.eup %1036  ;;  %vm514_vm6 = vcmp.gt.f32.partialorder %v1589_v61, 0.0  ;;  %v636_v14 = vmax.f32 %v630_v8, 0.0  ;;  %v624_v15 = vmul.f32 %v1562_v18, %v436_v10 }
  0xa8   : > { %1058 = vlog2.f32 %v646_v52  ;;  %v1039_v7 = vpop.eup %1038  ;;  %vm599_vm7 = vcmp.gt.f32.partialorder %v1604_v9, 0.0  ;;  %v573_v16 = vmul.f32 0.6931472, %v1037_v13  ;;  %v647_v17 = vmax.f32 %v1684_v42, 1e-30 }
  0xa9   : > { %1060 = vpow2.f32 %v589_v6  ;;  %v437_v19 = vmin.f32 %v419_v11, 1.0  ;;  %v575_v21 = vmul.f32 0.6931472, %v1039_v7  ;;  %v1691_v22 = vstv %s1671_s7 }
  0xaa   : > { %v1693_v23 = vmin.f32 %v636_v14, 1.0  ;;  %v631_v24 = vadd.f32 %v1633_v39, %v624_v15  ;;  %v583_v29 = vmul.f32 %v1646_v0, %v573_v16  ;;  %1062 = vlog2.f32 %v647_v17 }
  0xab   : > { %v438_v30 = vmin.f32 %v420_v12, 1.0  ;;  %v584_v34 = vmul.f32 %v1646_v0, %v575_v21  ;;  %v625_v36 = vmul.f32 %v1562_v18, %v437_v19  ;;  %vm600_vm8 = vcmp.gt.f32.partialorder %v1625_v28, 0.0 }
  0xac   : > { %v1041_v20 = vpop.eup %1040  ;;  %v648_v35 = vmax.f32 %v1693_v23, 1e-30  ;;  %v591_v44 = vmul.f32 1.442695, %v583_v29  ;;  %v637_v45 = vmax.f32 %v631_v24, 0.0  ;;  %vm601_vm9 = vcmp.gt.f32.partialorder %v1648_v1, 0.0 }
  0xad   : > { %v1043_v25 = vpop.eup %1042  ;;  %v515_v27 = vmin.f32 %v1041_v20, 1.0  ;;  %v593_v50 = vmul.f32 1.442695, %v584_v34  ;;  %v632_v15 = vadd.f32 %v1633_v39, %v625_v36  ;;  %v626_v20 = vmul.f32 %v1562_v18, %v438_v30 }
  0xae   : > { %v1045_v31 = vpop.eup %1044  ;;  %v516_v33 = vmin.f32 %v1043_v25, 1.0  ;;  %1064 = vpow2.f32 %v591_v44  ;;  %v1722_v11 = vmin.f32 %v637_v45, 1.0  ;;  %vm602_vm10 = vcmp.gt.f32.partialorder %v1650_v2, 0.0 }
  0xaf   : > { %v1047_v37 = vpop.eup %1046  ;;  %v521_v38 = vsel %vm509_vm0, %v515_v27, 0.0  ;;  %v517_v40 = vmin.f32 %v1045_v31, 1.0  ;;  %1066 = vpow2.f32 %v593_v50  ;;  %v638_v19 = vmax.f32 %v632_v15, 0.0 }
  0xb0   : > { %v1049_v46 = vpop.eup %1048  ;;  %v527_v47 = vmul.f32 %v521_v38, %v439_v26  ;;  %v522_v48 = vsel %vm510_vm1, %v516_v33, 0.0  ;;  %v518_v49 = vmin.f32 %v1047_v37, 1.0  ;;  %1068 = vlog2.f32 %v648_v35 }
  0xb1   : > { %v1051_v51 = vpop.eup %1050  ;;  %v528_v52 = vmul.f32 %v522_v48, %v440_v32  ;;  %v523_v53 = vsel %vm511_vm2, %v517_v40, 0.0  ;;  %v519_v54 = vmin.f32 %v1049_v46, 1.0  ;;  %v649_v16 = vmax.f32 %v1722_v11, 1e-30 }
  0xb2   : > { %v1053_v55 = vpop.eup %1052  ;;  %702 = vst.msk [vmem:[%s1708_s8] sm:$0xff] %vm701_vm3, %v527_v47  ;;  %v529_v56 = vmul.f32 %v523_v53, %v439_v26  ;;  %v524_v58 = vsel %vm512_vm4, %v518_v49, 0.0  ;;  %v520_v62 = vmin.f32 %v1051_v51, 1.0  ;;  %v1741_v27 = vmin.f32 %v638_v19, 1.0 }
  0xb3   : > { %v1055_v57 = vpop.eup %1054  ;;  %703 = vst.msk [vmem:[%s1708_s8 + $0x8] sm:$0xff] %vm701_vm3, %v528_v52  ;;  %v530_v63 = vmul.f32 %v524_v58, %v440_v32  ;;  %v525_v3 = vsel %vm513_vm5, %v519_v54, 0.0  ;;  %v605_v4 = vmin.f32 %v1053_v55, 1.0  ;;  %1070 = vlog2.f32 %v649_v16 }
  0xb4   : > { %v1057_v6 = vpop.eup %1056  ;;  %704 = vst.msk [vmem:[%s1708_s8 + $0x10] sm:$0xff] %vm701_vm3, %v529_v56  ;;  %v531_v8 = vmul.f32 %v525_v3, %v439_v26  ;;  %v526_v59 = vsel %vm514_vm6, %v520_v62, 0.0  ;;  %v577_v10 = vmul.f32 0.6931472, %v1055_v57  ;;  %v633_v29 = vadd.f32 %v1633_v39, %v626_v20 }
  0xb5   : > { %v1059_v12 = vpop.eup %1058  ;;  %705 = vst.msk [vmem:[%s1708_s8 + $0x18] sm:$0xff] %vm701_vm3, %v530_v63  ;;  %v532_v60 = vmul.f32 %v526_v59, %v440_v32  ;;  %v611_v13 = vsel %vm599_vm7, %v605_v4, 0.0  ;;  %v579_v14 = vmul.f32 0.6931472, %v1057_v6  ;;  %v650_v18 = vmax.f32 %v1741_v27, 1e-30 }
  0xb6   : > { %706 = vst.msk [vmem:[%s1708_s8 + $0x20] sm:$0xff] %vm701_vm3, %v531_v8  ;;  %708 = vst.msk [vmem:[%s1708_s8 + $0x30] sm:$0xff] %vm701_vm3, %v611_v13  ;;  %v585_v61 = vmul.f32 %v1646_v0, %v577_v10  ;;  %v653_v7 = vmul.f32 0.6931472, %v1059_v12  ;;  %v1061_v17 = vpop.eup %1060  ;;  %vm603_vm11 = vcmp.gt.f32.partialorder %v1652_v5, 0.0  ;;  %vm604_vm12 = vcmp.gt.f32.partialorder %v1660_v41, 0.0 }
  0xb7   : > { %707 = vst.msk [vmem:[%s1708_s8 + $0x28] sm:$0xff] %vm701_vm3, %v532_v60  ;;  %v586_v9 = vmul.f32 %v1646_v0, %v579_v14  ;;  %v606_v21 = vmin.f32 %v1061_v17, 1.0  ;;  %v1063_v31 = vpop.eup %1062  ;;  %v639_v0 = vmax.f32 %v633_v29, 0.0  ;;  %vm683_vm13 = vcmp.gt.f32.partialorder %v1662_v43, 0.0 }
  0xb8   : > { %v595_v24 = vmul.f32 1.442695, %v585_v61  ;;  %v665_v25 = vmul.f32 %v1691_v22, %v653_v7  ;;  %v655_v28 = vmul.f32 0.6931472, %v1063_v31  ;;  %vm684_vm14 = vcmp.gt.f32.partialorder %v1684_v42, 0.0 }
  0xb9   : > { %v597_v26 = vmul.f32 1.442695, %v586_v9  ;;  %v612_v32 = vsel %vm600_vm8, %v606_v21, 0.0  ;;  %v1749_v39 = vmin.f32 %v639_v0, 1.0  ;;  %vm685_vm15 = vcmp.gt.f32.partialorder %v1693_v23, 0.0 }
  0xba   : > { %1072 = vpow2.f32 %v595_v24  ;;  %v671_v33 = vmul.f32 1.442695, %v665_v25  ;;  %709 = vst.msk [vmem:[%s1708_s8 + $0x38] sm:$0xff] %vm701_vm3, %v612_v32  ;;  %v666_v30 = vmul.f32 %v1691_v22, %v655_v28  ;;  %vm686_vm0 = vcmp.gt.f32.partialorder %v1722_v11, 0.0 }
  0xbb   : > { %1074 = vpow2.f32 %v597_v26  ;;  %v1065_v34 = vpop.eup %1064  ;;  %v651_v44 = vmax.f32 %v1749_v39, 1e-30  ;;  %vm687_vm1 = vcmp.gt.f32.partialorder %v1741_v27, 0.0  ;;  %vm688_vm2 = vcmp.gt.f32.partialorder %v1749_v39, 0.0 }
  0xbc   : > { %1076 = vpow2.f32 %v671_v33  ;;  %v1067_v35 = vpop.eup %1066  ;;  %v607_v36 = vmin.f32 %v1065_v34, 1.0  ;;  %v673_v37 = vmul.f32 1.442695, %v666_v30 }
  0xbd   : > { %1078 = vlog2.f32 %v650_v18  ;;  %v1069_v38 = vpop.eup %1068  ;;  %v608_v40 = vmin.f32 %v1067_v35, 1.0 }
  0xbe   : > { %v613_v45 = vsel %vm601_vm9, %v607_v36, 0.0  ;;  %1080 = vpow2.f32 %v673_v37  ;;  %v657_v46 = vmul.f32 0.6931472, %v1069_v38 }
  0xbf   : > { %710 = vst.msk [vmem:[%s1708_s8 + $0x40] sm:$0xff] %vm701_vm3, %v613_v45  ;;  %v614_v47 = vsel %vm602_vm10, %v608_v40, 0.0  ;;  %1082 = vlog2.f32 %v651_v44 }
  0xc0   : > { %711 = vst.msk [vmem:[%s1708_s8 + $0x48] sm:$0xff] %vm701_vm3, %v614_v47  ;;  %v667_v1 = vmul.f32 %v1691_v22, %v657_v46  ;;  %v1071_v48 = vpop.eup %1070 }
  0xc1   : > { %v659_v2 = vmul.f32 0.6931472, %v1071_v48 }
  0xc2   : > { %v675_v49 = vmul.f32 1.442695, %v667_v1 }
  0xc3   : > { %v668_v53 = vmul.f32 %v1691_v22, %v659_v2 }
  0xc4   : > { %1084 = vpow2.f32 %v675_v49 }
  0xc5   : > { %v677_v57 = vmul.f32 1.442695, %v668_v53 }
  0xc7   : > { %v1073_v50 = vpop.eup %1072  ;;  %1086 = vpow2.f32 %v677_v57 }
  0xc8   : > { %v1075_v51 = vpop.eup %1074  ;;  %v609_v52 = vmin.f32 %v1073_v50, 1.0 }
  0xc9   : > { %v1077_v54 = vpop.eup %1076  ;;  %v610_v55 = vmin.f32 %v1075_v51, 1.0 }
  0xca   : > { %v1079_v56 = vpop.eup %1078  ;;  %v615_v58 = vsel %vm603_vm11, %v609_v52, 0.0  ;;  %v689_v62 = vmin.f32 %v1077_v54, 1.0 }
  0xcb   : > { %712 = vst.msk [vmem:[%s1708_s8 + $0x50] sm:$0xff] %vm701_vm3, %v615_v58  ;;  %v616_v5 = vsel %vm604_vm12, %v610_v55, 0.0  ;;  %v661_v63 = vmul.f32 0.6931472, %v1079_v56  ;;  %v1081_v4 = vpop.eup %1080 }
  0xcc   : > { %713 = vst.msk [vmem:[%s1708_s8 + $0x58] sm:$0xff] %vm701_vm3, %v616_v5  ;;  %v695_v3 = vsel %vm683_vm13, %v689_v62, 0.0  ;;  %v1083_v43 = vpop.eup %1082  ;;  %v690_v6 = vmin.f32 %v1081_v4, 1.0 }
  0xcd   : > { %714 = vst.msk [vmem:[%s1708_s8 + $0x60] sm:$0xff] %vm701_vm3, %v695_v3  ;;  %v669_v41 = vmul.f32 %v1691_v22, %v661_v63  ;;  %v663_v59 = vmul.f32 0.6931472, %v1083_v43 }
  0xce   : > { %v696_v10 = vsel %vm684_vm14, %v690_v6, 0.0 }
  0xcf   : > { %v679_v8 = vmul.f32 1.442695, %v669_v41  ;;  %715 = vst.msk [vmem:[%s1708_s8 + $0x68] sm:$0xff] %vm701_vm3, %v696_v10  ;;  %v670_v12 = vmul.f32 %v1691_v22, %v663_v59 }
  0xd1   : > { %1088 = vpow2.f32 %v679_v8  ;;  %v1085_v60 = vpop.eup %1084  ;;  %v681_v13 = vmul.f32 1.442695, %v670_v12 }
  0xd2   : > { %v691_v14 = vmin.f32 %v1085_v60, 1.0 }
  0xd3   : > { %1090 = vpow2.f32 %v681_v13 }
  0xd4   : > { %v697_v42 = vsel %vm685_vm15, %v691_v14, 0.0  ;;  %v1087_v15 = vpop.eup %1086 }
  0xd5   : > { %716 = vst.msk [vmem:[%s1708_s8 + $0x70] sm:$0xff] %vm701_vm3, %v697_v42  ;;  %v692_v61 = vmin.f32 %v1087_v15, 1.0 }
  0xd7   : > { %v698_v7 = vsel %vm686_vm0, %v692_v61, 0.0 }
  0xd8   : > { %717 = vst.msk [vmem:[%s1708_s8 + $0x78] sm:$0xff] %vm701_vm3, %v698_v7 }
  0xde   : > { %v1089_v22 = vpop.eup %1088 }
  0xdf   : > { %v693_v23 = vmin.f32 %v1089_v22, 1.0 }
  0xe0   : > { %v1091_v17 = vpop.eup %1090 }
  0xe1   : > { %v699_v16 = vsel %vm687_vm1, %v693_v23, 0.0  ;;  %v694_v11 = vmin.f32 %v1091_v17, 1.0 }
  0xe2   : > { %718 = vst.msk [vmem:[%s1708_s8 + $0x80] sm:$0xff] %vm701_vm3, %v699_v16 }
  0xe3   : > { %v700_v9 = vsel %vm688_vm2, %v694_v11, 0.0 }
  0xe4   : > { %719 = vst.msk [vmem:[%s1708_s8 + $0x88] sm:$0xff] %vm701_vm3, %v700_v9 }
  0xe5   : > { %1215 = shalt.err (!%p1212_p7)
}
  0xe6   : > { %s1216_s20 = scalar_lea.hbm %s1788_s16, 2304  ;;  %s1220_s13 = scalar_lea.hbm %s1846_s6, 4608 }
  0xe7   : > { %p1217_p11 = scmp.ne.s32.totalorder %s1788_s16, %s1216_s20  ;;  %p1221_p13 = scmp.lt.s32.totalorder %s1788_s16, %s1846_s6 }
  0xe8   : > { %p1222_p4 = scmp.lt.s32.totalorder %s1220_s13, %s1216_s20 }
  0xe9   : > { %p1218_p10 = pnand %p1217_p11, %p1471_p0 }
  0xea   : > { %p1223_p1 = por %p1222_p4, %p1221_p13 }
  0xeb   : > { %p1219_p12 = pneg %p1218_p10 }
  0xed   : > { %p1224_p3 = pnand %p1223_p1, %p1219_p12 }
  0xef   : > { %1227 = shalt.err (!%p1224_p3)
}
  0xf0   : > { %s1309_s8 = smov 128   ;;  %s1310_s1 = smov 8  }
  0xf1   : > { %925 = dma.vmem_to_hbm [thread:$0]  (%p1471_p0), %s1790_s15, 2304, %s1788_s16, %s721_s24, %s1309_s8, %s1309_s8, %s1310_s1  }
  0xf2 PF: > { %s751_s11 = sand.u32 1, %s1278_s21   ;;  %p1865_p6 = scmp.ge.s32.totalorder %s1298_s26, 2 }
  0xf3   : > { %s752_s27 = scalar_lea.sflag [#allocation4], %s751_s11 }
  0xf4   : > { %p948_p8 = pnand %p1865_p6, %p1479_p2 }
  0xf6   : > { %p949_p5 = pneg %p948_p8 }
  0xf8   : > { %1273 = dma.done.wait (%p949_p5), %s752_s27, 2304  }
  0xf9   : > { %1275 = vsyncadd (%p949_p5), %s752_s27, 4294964992  ;;  %s26_s26 = sadd.s32 1, %s1298_s26   ;;  %s1866_s21 = smov %s1282_s22 }
  0xfa   : > { %p23_p9 = scmp.ge.s32.totalorder %s26_s26, 4   ;;  %s1867_s22 = smov %s1286_s23 }
  0xfb   : > { %s1868_s23 = smov %s1477_s9  ;;  %s1869_s24 = smov %s1294_s25 }
  0xfc   : > { %s1870_s25 = smov %s1872_s19  ;;  %25 = sbr.rel (!%p23_p9) target bundleno = 14 (0xe), region = 113 }
 0x101   :  { %757 = vsyncpa [#allocation3], 1 }
 0x102   :  { %759 = vsyncpa [#allocation3 + $0x1], 1 }
 0x103   :  { %760 = vsyncpa [#allocation13], 1 }
 0x104   :  { %762 = vsyncpa [#allocation13 + $0x1], 1 }
 0x105   :  { %763 = vsyncpa [#allocation4], 1 }
 0x106   :  { %765 = vsyncpa [#allocation4 + $0x1], 1 }
 0x107   :  { %766 = vsyncpa [#allocation5], 1 }
 0x108   :  { %768 = vsyncpa [#allocation5 + $0x1], 1 }
 0x109   :  { %769 = vsyncpa [#allocation6], 1 }
 0x10a   :  { %771 = vsyncpa [#allocation6 + $0x1], 1 }
 0x10b   :  { %772 = vsyncpa [#allocation9], 1 }

</bundles_post_ra>
